<compile_context>
chip_gen: v7x
topology: tpu7x:2x2x1
jax: 0.10.0
libtpu: 0.0.40
codegen_flags: <defaults>
</compile_context>

<pallas_src>
import jax
import jax.numpy as jnp
from jax.experimental import pallas as pl
from jax.experimental.pallas import tpu as pltpu


def _se_kernel(x_ref, w1t_ref, w2t_ref, o_ref):
    # x_ref: (Bb, C, HW) block; channels on sublanes, flattened H*W on lanes.

    # Squeeze: global average pool over the spatial (lane) axis -> (Bb, C), f32.
    pooled = jnp.mean(x_ref[...].astype(jnp.float32), axis=2)

    # Excite: tiny FC  C -> C/r -> C  as two VMEM matmuls (f32 accumulate),
    # one sigmoid over the whole (Bb, C) tile.
    hidden = jnp.maximum(
        jnp.dot(pooled, w1t_ref[...], preferred_element_type=jnp.float32), 0.0
    )                                                          # (Bb, Cr)
    logits = jnp.dot(hidden, w2t_ref[...],
                     preferred_element_type=jnp.float32)        # (Bb, C)
    scale = jax.nn.sigmoid(logits)                              # (Bb, C), f32

    # Scale: re-read x and multiply in the output dtype (broadcast over lanes).
    # No (Bb, C, HW) f32 temp survives the FC; the epilogue is load->mul->store.
    o_ref[...] = x_ref[...] * scale.astype(o_ref.dtype)[:, :, None]


def _vmem_capacity_bytes():
    try:
        return int(pltpu.get_tpu_info().vmem_capacity_bytes)
    except Exception:
        return 64 << 20  # conservative default (v7x per-TensorCore)


def _pick_batch_tile(B, bytes_per_batch, block_budget):
    """Largest divisor of B fitting the byte budget, preferring >= 2..8 grid steps."""
    divisors = [d for d in range(1, B + 1) if B % d == 0]
    for min_steps in (min(B, 8), min(B, 2), 1):
        fits = [d for d in divisors
                if d * bytes_per_batch <= block_budget and B // d >= min_steps]
        if fits:
            return max(fits)
    # Even a single batch element exceeds the budget; vmem_limit_bytes below is
    # sized to cover it.
    # TODO(synk): add an HW-tiled two-phase path (partial pooled sums with a
    # pl.when-initialized scratch, then a second scaling pass) for activations
    # where bb=1 still overflows scoped VMEM (e.g. 64x224x224 on v7x).
    return 1


def se_pallas(x, w1, w2):
    """SqueezeAndExcitation forward.

    x : (B, C, H, W)
    w1: (C//r, C)   -- Conv2d(C, C//r, 1, bias=False) weight, squeezed
    w2: (C, C//r)   -- Conv2d(C//r, C, 1, bias=False) weight, squeezed
    """
    B, C, H, W = x.shape
    Cr = w1.shape[0]
    HW = H * W
    xf = x.reshape(B, C, HW)  # keep caller dtype at the HBM boundary
    itemsize = xf.dtype.itemsize

    # Generation-aware block budget: the binding constraint is scoped VMEM.
    # v7x has 64 MiB physical -> ~2 MiB blocks; v5e/v6e (128 MiB) -> ~4 MiB.
    phys_vmem = _vmem_capacity_bytes()
    block_budget = (4 << 20) if phys_vmem >= (128 << 20) else (2 << 20)

    bb = _pick_batch_tile(B, C * HW * itemsize, block_budget)
    grid = (B // bb,)

    # Pre-transpose the FC weights (kept in the input dtype, not promoted).
    w_dtype = x.dtype
    w1t = jnp.asarray(w1).astype(w_dtype).T  # (C, Cr)
    w2t = jnp.asarray(w2).astype(w_dtype).T  # (Cr, C)

    # Explicit VMEM budget from the real per-step footprint:
    #   2x double-buffered input block + 2x output block
    #   + worst-case f32 staging for the pooling reduce
    #   + double-buffered weights + small FC tiles + headroom.
    block_bytes = bb * C * HW * itemsize
    weight_bytes = 2 * C * Cr * w_dtype.itemsize
    footprint = (
        4 * block_bytes
        + bb * C * HW * 4
        + 2 * weight_bytes
        + 4 * bb * C * 4
    )
    vmem_limit = int(min(phys_vmem * 3 // 4,
                         max(footprint + (4 << 20), 16 << 20)))

    cost = pl.CostEstimate(
        flops=2 * 2 * B * C * Cr + 2 * B * C * HW,   # two tiny FCs + pool/scale
        transcendentals=B * C,                        # sigmoid
        bytes_accessed=2 * B * C * HW * itemsize + weight_bytes,
    )

    out = pl.pallas_call(
        _se_kernel,
        out_shape=jax.ShapeDtypeStruct((B, C, HW), x.dtype),
        grid=grid,
        in_specs=[
            pl.BlockSpec((bb, C, HW), lambda b: (b, 0, 0)),   # x block (VMEM)
            pl.BlockSpec((C, Cr), lambda b: (0, 0)),          # w1^T (VMEM, resident)
            pl.BlockSpec((Cr, C), lambda b: (0, 0)),          # w2^T (VMEM, resident)
        ],
        out_specs=pl.BlockSpec((bb, C, HW), lambda b: (b, 0, 0)),
        compiler_params=pltpu.CompilerParams(
            dimension_semantics=("parallel",),
            vmem_limit_bytes=vmem_limit,
        ),
        cost_estimate=cost,
    )(xf, w1t, w2t)
    return out.reshape(B, C, H, W)


def se_reference(x, w1, w2):
    """Pure-JAX reference matching the PyTorch forward."""
    avg = jnp.mean(x.astype(jnp.float32), axis=(2, 3))        # (B, C)  AdaptiveAvgPool2d(1)
    h = jnp.maximum(avg @ w1.T, 0.0)                          # (B, Cr) fc1 + ReLU
    s = jax.nn.sigmoid(h @ w2.T)                              # (B, C)  fc2 + sigmoid
    return (x.astype(jnp.float32) * s[:, :, None, None]).astype(x.dtype)


if __name__ == "__main__":
    B, C, H, W = 2, 4, 16, 16
    reduction_rate = 2
    Cr = C // reduction_rate

    key = jax.random.PRNGKey(0)
    kx, k1, k2 = jax.random.split(key, 3)

    x = jax.random.normal(kx, (B, C, H, W), dtype=jnp.float32)
    # Conv2d(C, C//r, 1, bias=False) / Conv2d(C//r, C, 1, bias=False) weights, squeezed.
    w1 = 0.4 * jax.random.normal(k1, (Cr, C), dtype=jnp.float32)
    w2 = 0.4 * jax.random.normal(k2, (C, Cr), dtype=jnp.float32)

    out = se_pallas(x, w1, w2)
    out = jax.block_until_ready(out)

    ref = se_reference(x, w1, w2)
    assert out.shape == (B, C, H, W)
    assert jnp.allclose(out, ref, atol=1e-5, rtol=1e-5), float(jnp.max(jnp.abs(out - ref)))

    print("KERNEL_OK")
</pallas_src>

<mosaic_0001>
module attributes {stable_mosaic.version = 11 : i64} {
  func.func @_se_kernel(%arg0: i32, %arg1: memref<1x4x256xf32, #tpu.memory_space<vmem>>, %arg2: memref<4x2xf32, #tpu.memory_space<vmem>>, %arg3: memref<2x4xf32, #tpu.memory_space<vmem>>, %arg4: memref<1x4x256xf32, #tpu.memory_space<vmem>>) attributes {dimension_semantics = [#tpu.dimension_semantics<parallel>], iteration_bounds = array<i64: 2>, scalar_prefetch = 0 : i64, scratch_operands = 0 : i64, tpu.core_type = #tpu.core_type<tc>, window_params = [{transform_indices = @transform_0, window_bounds = array<i64: 1, 4, 256>}, {pipeline_mode = #tpu.pipeline_mode<synchronous>, transform_indices = @transform_1, window_bounds = array<i64: 4, 2>}, {pipeline_mode = #tpu.pipeline_mode<synchronous>, transform_indices = @transform_2, window_bounds = array<i64: 2, 4>}, {transform_indices = @transform_3, window_bounds = array<i64: 1, 4, 256>}]} {
    %c0 = arith.constant 0 : index
    %c0_0 = arith.constant 0 : index
    %c0_1 = arith.constant 0 : index
    %0 = vector.load %arg1[%c0, %c0_0, %c0_1] : memref<1x4x256xf32, #tpu.memory_space<vmem>>, vector<1x4x256xf32>
    %cst = arith.constant dense<0.000000e+00> : vector<1x4xf32>
    %1 = vector.multi_reduction <add>, %0, %cst [2] : vector<1x4x256xf32> to vector<1x4xf32>
    %cst_2 = arith.constant 2.560000e+02 : f32
    %2 = vector.broadcast %cst_2 : f32 to vector<1x4xf32>
    %3 = arith.divf %1, %2 : vector<1x4xf32>
    %c0_3 = arith.constant 0 : index
    %c0_4 = arith.constant 0 : index
    %4 = vector.load %arg2[%c0_3, %c0_4] : memref<4x2xf32, #tpu.memory_space<vmem>>, vector<4x2xf32>
    %cst_5 = arith.constant dense<0.000000e+00> : vector<1x2xf32>
    %5 = tpu.matmul %3, %4, %cst_5 {dimension_numbers = #tpu.dot_dimension_numbers<[1], [0], [0], [1], [0, 0, 1, 1], [], []>} : vector<1x4xf32>, vector<4x2xf32>, vector<1x2xf32> -> vector<1x2xf32>
    %cst_6 = arith.constant 0.000000e+00 : f32
    %6 = vector.broadcast %cst_6 : f32 to vector<1x2xf32>
    %7 = arith.maximumf %5, %6 : vector<1x2xf32>
    %c0_7 = arith.constant 0 : index
    %c0_8 = arith.constant 0 : index
    %8 = vector.load %arg3[%c0_7, %c0_8] : memref<2x4xf32, #tpu.memory_space<vmem>>, vector<2x4xf32>
    %cst_9 = arith.constant dense<0.000000e+00> : vector<1x4xf32>
    %9 = tpu.matmul %7, %8, %cst_9 {dimension_numbers = #tpu.dot_dimension_numbers<[1], [0], [0], [1], [0, 0, 1, 1], [], []>} : vector<1x2xf32>, vector<2x4xf32>, vector<1x4xf32> -> vector<1x4xf32>
    %10 = arith.negf %9 : vector<1x4xf32>
    %11 = math.exp %10 : vector<1x4xf32>
    %cst_10 = arith.constant 1.000000e+00 : f32
    %12 = vector.broadcast %cst_10 : f32 to vector<1x4xf32>
    %13 = arith.addf %12, %11 : vector<1x4xf32>
    %14 = arith.divf %12, %13 : vector<1x4xf32>
    %c0_11 = arith.constant 0 : index
    %c0_12 = arith.constant 0 : index
    %c0_13 = arith.constant 0 : index
    %15 = vector.load %arg1[%c0_11, %c0_12, %c0_13] : memref<1x4x256xf32, #tpu.memory_space<vmem>>, vector<1x4x256xf32>
    %16 = vector.shape_cast %14 : vector<1x4xf32> to vector<1x4x1xf32>
    %17 = vector.broadcast %16 : vector<1x4x1xf32> to vector<1x4x256xf32>
    %18 = arith.mulf %15, %17 : vector<1x4x256xf32>
    %c0_14 = arith.constant 0 : index
    %c0_15 = arith.constant 0 : index
    %c0_16 = arith.constant 0 : index
    %19 = vector.load %arg4[%c0_14, %c0_15, %c0_16] : memref<1x4x256xf32, #tpu.memory_space<vmem>>, vector<1x4x256xf32>
    tpu.vector_store %arg4[%c0_14, %c0_15, %c0_16], %18 {strides = array<i32>} : memref<1x4x256xf32, #tpu.memory_space<vmem>>, vector<1x4x256xf32>,
    return
  }
  func.func @transform_0(%arg0: i32) -> (i32, i32, i32) {
    %c0_i32 = arith.constant 0 : i32
    %c0_i32_0 = arith.constant 0 : i32
    %c0_i32_1 = arith.constant 0 : i32
    return %arg0, %c0_i32, %c0_i32_0 : i32, i32, i32
  }
  func.func @transform_1(%arg0: i32) -> (i32, i32) {
    %c0_i32 = arith.constant 0 : i32
    %c0_i32_0 = arith.constant 0 : i32
    %c0_i32_1 = arith.constant 0 : i32
    return %c0_i32, %c0_i32_0 : i32, i32
  }
  func.func @transform_2(%arg0: i32) -> (i32, i32) {
    %c0_i32 = arith.constant 0 : i32
    %c0_i32_0 = arith.constant 0 : i32
    %c0_i32_1 = arith.constant 0 : i32
    return %c0_i32, %c0_i32_0 : i32, i32
  }
  func.func @transform_3(%arg0: i32) -> (i32, i32, i32) {
    %c0_i32 = arith.constant 0 : i32
    %c0_i32_0 = arith.constant 0 : i32
    %c0_i32_1 = arith.constant 0 : i32
    return %arg0, %c0_i32, %c0_i32_0 : i32, i32, i32
  }
}

</mosaic_0001>

<bundles_post_ra>
// kernel: tpu_custom_call.1
= control target key start
LH: loop header
LB: loop body
LE: loop exit
PB: predicated region body
PF: predicated region fallthrough
CT: control target
= control target key end

     0   :  { %8 = vsyncpa [#allocation3], 0  ;;  %s855_s0 = inlined_call_operand.hbm [shape: f32[2,4,256], index: 0, kind: input, shape index: {}]   ;;  %s856_s1 = inlined_call_operand.vmem [shape: f32[4,2], index: 1, kind: input, shape index: {}]   ;;  %s857_s2 = inlined_call_operand.vmem [shape: f32[2,4], index: 2, kind: input, shape index: {}]   ;;  %s858_s3 = inlined_call_operand.hbm [shape: f32[2,4,256], index: 3, kind: output, shape index: {}]  }
   0x1   :  { %10 = vsyncpa [#allocation3 + $0x1], 0 }
   0x2   :  { %11 = vsyncpa [#allocation4], 0 }
   0x3   :  { %13 = vsyncpa [#allocation4 + $0x1], 0  ;;  %s684_s12 = smov 0   ;;  %s686_s13 = smov 0  }
   0x4   :  { %s688_s14 = smov 0   ;;  %s690_s15 = smov 0  }
   0x5 LB: > { %s705_s16 = sadd.s32 4294967295, %s657_s15   ;;  %s472_s17 = sadd.s32 4294967294, %s657_s15   ;;  %s657_s15 = sphi %s690_s15, %s873_s15   ;;  %s653_s14 = sphi %s688_s14, %s872_s14   ;;  %s649_s13 = sphi %s686_s13, %s871_s13   ;;  %s645_s12 = sphi %s684_s12, %s870_s12  }
   0x6   : > { %s709_s18 = sadd.s32 1, %s657_s15   ;;  %s26_s19 = sadd.s32 1, %s653_s14 }
   0x7   : > { %s23_s20 = ssub.s32 %s657_s15, %s709_s18  ;;  %p33_p0 = scmp.ne.s32.totalorder %s653_s14, %s649_s13 }
   0x8   : > { %p24_p1 = scmp.eq.s32.totalorder %s23_s20, 0  ;;  %p34_p2 = scmp.eq.s32.totalorder %s657_s15, 0 }
   0x9   : > { %p39_p3 = scmp.ne.s32.totalorder %s649_s13, %s645_s12  ;;  %p40_p4 = scmp.eq.s32.totalorder %s705_s16, 0 }
   0xa   : > { %s721_s21 = scalar_select %p24_p1, %s653_s14, %s26_s19  }
   0xb   : > { %p723_p5 = por %p34_p2, %p33_p0  ;;  %p727_p6 = por %p40_p4, %p39_p3 }
   0xc   : > { %p105_p7 = scmp.eq.s32.totalorder %s705_s16, 1  ;;  %p111_p8 = scmp.eq.s32.totalorder %s472_s17, 1 }
   0xd   : > { %p519_p10 = scmp.lt.s32.totalorder %s657_s15, 2  ;;  %s137_s26 = sand.u32 1, %s653_s14  }
   0xe   : > { %p734_p11 = por %p105_p7, %p33_p0  ;;  %p738_p12 = por %p111_p8, %p39_p3 }
   0xf   : > { %s491_s27 = sshll.u32 %s657_s15, 7  ;;  %s475_s28 = sshll.u32 %s137_s26, 3 }
  0x10   : > { %s862_s24 = scalar_select %p734_p11, 1, 0 }
  0x11   : > { %s863_s25 = scalar_select %p738_p12, 1, 0 }
  0x12   : > { %s747_s4 = scalar_lea.hbm %s855_s0, %s491_s27  ;;  %s141_s5 = scalar_lea.vmem [#allocation2], %s475_s28 }
  0x13   : > { %s149_s6 = sshll.u32 %s141_s5, 4  ;;  %p751_p13 = pnand %p519_p10, %p723_p5  ;;  %s755_s6 = int_to_ptr.vmem [resolvable:$true] %s149_s6 }
  0x14   : > { %s138_s8 = scalar_lea.sflag [#allocation3], %s137_s26  ;;  %s561_s9 = scalar_lea.hbm %s747_s4, 128 }
  0x15   : > { %p562_p2 = scmp.ne.s32.totalorder %s747_s4, %s561_s9  ;;  %p563_p3 = pneg %p751_p13 }
  0x16   : > { %s566_s17 = scalar_lea.hbm %s855_s0, 256  ;;  %p567_p5 = scmp.lt.u32.totalorder %s747_s4, %s855_s0 }
  0x17   : > { %p564_p4 = pnand %p563_p3, %p562_p2  ;;  %p568_p8 = scmp.lt.u32.totalorder %s566_s17, %s561_s9 }
  0x18   : > { %p570_p9 = scmp.lt.u32.totalorder %s561_s9, %s747_s4 }
  0x19   : > { %p565_p7 = pneg %p564_p4  ;;  %p569_p10 = por %p568_p8, %p567_p5 }
  0x1b   : > { %p571_p0 = por %p570_p9, %p569_p10 }
  0x1d   : > { %p572_p1 = pnand %p571_p0, %p565_p7 }
  0x1f   : > { %575 = shalt.err (!%p572_p1)
}
  0x20   : > { %s576_s22 = scalar_lea.vmem %s755_s6, 128  ;;  %s659_s26 = smov [#allocation2]  }
  0x21   : > { %p577_p2 = scmp.ne.s32.totalorder %s755_s6, %s576_s22  ;;  %s581_s27 = sshll.u32 %s659_s26, 4  ;;  %s582_s27 = int_to_ptr.vmem [resolvable:$false] %s581_s27 }
  0x22   : > { %s583_s28 = scalar_lea.vmem %s582_s27, 256  ;;  %p584_p11 = scmp.lt.s32.totalorder %s755_s6, %s582_s27 }
  0x23   : > { %p579_p4 = pnand %p577_p2, %p563_p3  ;;  %p585_p5 = scmp.lt.s32.totalorder %s583_s28, %s576_s22 }
  0x25   : > { %p580_p12 = pneg %p579_p4  ;;  %p586_p8 = por %p585_p5, %p584_p11 }
  0x27   : > { %p587_p9 = pnand %p586_p8, %p580_p12 }
  0x29   : > { %590 = shalt.err (!%p587_p9)
}
  0x2a   : > { %514 = dma.hbm_to_vmem [thread:$0]  (!%p751_p13), %s747_s4, 128, %s755_s6, %s138_s8  }
  0x2b   : > { %p865_p0 = scmp.lt.s32.totalorder %s657_s15, 3  ;;  %p866_p1 = scmp.ge.s32.totalorder %s657_s15, 1 }
  0x2d   : > { %p155_p3 = pnand %p866_p1, %p865_p0 }
  0x2e   : > { %s789_s29 = sand.u32 (!%p155_p3), 1, %s649_s13  }
  0x2f   : > { %158 = sbr.rel (%p155_p3) target bundleno = 794 (0x31a), region = 32  ;;  %s479_s30 = sshll.u32 (!%p155_p3), %s789_s29, 3 }
  0x30   : > { %s161_s5 = scalar_lea.sflag (!%p155_p3), [#allocation3], %s789_s29  ;;  %s164_s7 = scalar_lea.vmem (!%p155_p3), [#allocation2], %s479_s30 }
  0x36   : > { %636 = dma.done.wait (%p727_p6), %s161_s5, 128  }
  0x37   : > { %638 = vsyncadd (%p727_p6), %s161_s5, 4294967168  ;;  %vm191_vm0 = vcmask 1043456   ;;  %v187_v0 = vld [vmem:[%s164_s7] sm:$0xff]  ;;  %v660_v5 = vmov 0.0   ;;  %vm661_vm1 = vmmov 0   ;;  %v201_v7 = vlaneseq  ;;  %s492_s9 = sshll.u32 %s705_s16, 7 }
  0x38   : > { %v189_v1 = vcombine.high %v187_v0, %v187_v0  ;;  %v192_v2 = vsel %vm191_vm0, %v187_v0, 0.0  ;;  %497 = vmatprep.subr.mxu0 %v660_v5  ;;  %v199_v6 = vld [vmem:[%s856_s1] sm:$0xf]  ;;  %502 = vmatprep.subr.mxu1 %v660_v5  ;;  %vm207_vm2 = vcmask 31744   ;;  %vm289_vm3 = vcmask 1041408   ;;  %s186_s10 = scalar_lea.vmem [#allocation5], %s479_s30  ;;  %s811_s20 = scalar_lea.hbm %s858_s3, %s492_s9 }
  0x39   : > { %498 = vmatpush3.msk.msra.mxu0 %vm191_vm0, %v199_v6  ;;  %499 = vmatprep.mubr.msk.f32.mxu0 %vm661_vm1, %v660_v5  ;;  %v202_v8 = vand.u32 127, %v201_v7  ;;  %v204_v9 = vshrl.u32 %v201_v7, 7  ;;  %v284_v14 = vld [vmem:[%s857_s2] sm:$0x3]  ;;  %vm285_vm4 = vcmask 15360   ;;  %s402_s11 = sshll.u32 %s186_s10, 4  ;;  %s813_s11 = int_to_ptr.vmem [resolvable:$true] %s402_s11 }
  0x3a   : > { %v193_v3 = vsel %vm191_vm0, %v189_v1, 0.0  ;;  %504 = vmatprep.mubr.msk.f32.mxu1 %vm661_vm1, %v660_v5  ;;  %503 = vmatpush3.msk.msra.mxu1 %vm289_vm3, %v284_v14  ;;  %v662_v26 = vmov 839922192   ;;  %s388_s22 = scalar_lea.sflag [#allocation4], %s789_s29  ;;  %s591_s26 = scalar_lea.vmem %s813_s11, 128 }
  0x3b   : > { %v194_v4 = vadd.f32 %v193_v3, %v192_v2  ;;  %v205_v10 = vsub.s32 %v202_v8, %v204_v9  ;;  %v371_v23 = vsub.s32 0, %v204_v9  ;;  %v378_v27 = vunpack.c.l.s4 %v662_v26  ;;  %p592_p6 = scmp.ne.s32.totalorder %s813_s11, %s591_s26  ;;  %p867_p11 = scmp.ne.s32.totalorder %s862_s24, 0 }
  0x3c   : > { %s663_s16 = smov [#allocation5]  }
  0x3d   : > { %195 = vadd.xlane.f32.xlu0 %v194_v4  ;;  %v379_v28 = vunpack.c.0.s8 %v378_v27  ;;  %p593_p12 = pnand %p592_p6, %p867_p11  ;;  %s595_s27 = sshll.u32 %s663_s16, 4  ;;  %s596_s27 = int_to_ptr.vmem [resolvable:$false] %s595_s27 }
  0x3e   : > { %s597_s28 = scalar_lea.vmem %s596_s27, 256  ;;  %p598_p7 = scmp.lt.s32.totalorder %s813_s11, %s596_s27 }
  0x3f   : > { %v382_v29 = vsub.s32 %v379_v28, %v204_v9  ;;  %p594_p13 = pneg %p593_p12  ;;  %p599_p10 = scmp.lt.s32.totalorder %s597_s28, %s591_s26 }
  0x41   : > { %p600_p2 = por %p599_p10, %p598_p7 }
  0x43   : > { %p601_p4 = pnand %p600_p2, %p594_p13 }
  0xca   : > { %v196_v11 = vpop.xlane.xlu0 %195 }
  0xcb   : > { %v198_v12 = vmul.f32 0.00390625, %v196_v11 }
  0xcd   : > { %v206_v13 = vrot.slane %v198_v12, %v205_v10 }
  0xcf   : > { %500 = vmatmul.mubr.msk.f32.vlgmr.msra.gmra.mrb[0].mxu0 %vm207_vm2, %v206_v13 }
 0x1a2   : > { %v279_v15 = vpop.f32.mrb[0].mxu0 }
 0x1a3   : > { %v283_v16 = vmax.f32 %v279_v15, 0.0  ;;  %v501_v17 = vpop.f32.mrb[1].mxu0 }
 0x1a5   : > { %505 = vmatmul.mubr.msk.f32.vlgmr.msra.gmra.mrb[0].mxu1 %vm285_vm4, %v283_v16 }
 0x278   : > { %v359_v18 = vpop.f32.mrb[0].mxu1 }
 0x279   : > { %v485_v19 = vmul.f32 -1.442695, %v359_v18  ;;  %v506_v20 = vpop.f32.mrb[1].mxu1 }
 0x27b   : > { %557 = vpow2.f32 %v485_v19 }
 0x285   : > { %v558_v21 = vpop.eup %557 }
 0x286   : > { %v366_v22 = vadd.f32 1.0, %v558_v21 }
 0x288   : > { %559 = vrcp.f32 %v366_v22 }
 0x292   : > { %v560_v24 = vpop.eup %559 }
 0x293   : > { %v372_v25 = vrot.slane %v560_v24, %v371_v23 }
 0x295   : > { %374 = vbcast.lane.b32.xlu0 %v372_v25, 256 }
 0x307   : > { %v375_v30 = vpop.permute.xlu0 %374 }
 0x308   : > { %v383_v31 = vrot.slane %v375_v30, %v382_v29 }
 0x30a   : > { %v385_v32 = vmul.f32 %v383_v31, %v187_v0 }
 0x30c   : > { %386 = vst [vmem:[%s186_s10] sm:$0xff] %v385_v32 }
 0x30d   : > { %604 = shalt.err (!%p601_p4)
}
 0x30e   : > { %s605_s29 = scalar_lea.hbm %s811_s20, 128  ;;  %s609_s7 = scalar_lea.hbm %s858_s3, 256 }
 0x30f   : > { %p606_p5 = scmp.ne.s32.totalorder %s811_s20, %s605_s29  ;;  %p610_p0 = scmp.lt.u32.totalorder %s811_s20, %s858_s3 }
 0x310   : > { %p611_p1 = scmp.lt.u32.totalorder %s609_s7, %s605_s29  ;;  %p613_p6 = scmp.lt.u32.totalorder %s605_s29, %s811_s20 }
 0x311   : > { %p607_p8 = pnand %p606_p5, %p867_p11 }
 0x312   : > { %p612_p3 = por %p611_p1, %p610_p0 }
 0x313   : > { %p608_p9 = pneg %p607_p8 }
 0x314   : > { %p614_p12 = por %p613_p6, %p612_p3 }
 0x316   : > { %p615_p13 = pnand %p614_p12, %p608_p9 }
 0x318   : > { %618 = shalt.err (!%p615_p13)
}
 0x319   : > { %509 = dma.vmem_to_hbm [thread:$0]  (%p867_p11), %s813_s11, 128, %s811_s20, %s388_s22  }
 0x31a PF: > { %s414_s23 = sand.u32 1, %s645_s12   ;;  %p868_p7 = scmp.ne.s32.totalorder %s863_s25, 0 }
 0x31b   : > { %p869_p10 = scmp.ge.s32.totalorder %s657_s15, 2  ;;  %s415_s8 = scalar_lea.sflag [#allocation4], %s414_s23 }
 0x31d   : > { %p516_p2 = pnand %p869_p10, %p868_p7 }
 0x31f   : > { %640 = dma.done.wait (!%p516_p2), %s415_s8, 128  }
 0x320   : > { %642 = vsyncadd (!%p516_p2), %s415_s8, 4294967168  ;;  %p16_p4 = scmp.ge.s32.totalorder %s709_s18, 4   ;;  %s870_s12 = smov %s649_s13 }
 0x321   : > { %s871_s13 = smov %s653_s14  ;;  %s872_s14 = smov %s721_s21 }
 0x322   : > { %s873_s15 = smov %s709_s18  ;;  %18 = sbr.rel (!%p16_p4) target bundleno = 5 (0x5), region = 77 }
 0x329   :  { %420 = vsyncpa [#allocation3], 1 }
 0x32a   :  { %422 = vsyncpa [#allocation3 + $0x1], 1 }
 0x32b   :  { %423 = vsyncpa [#allocation4], 1 }
 0x32c   :  { %425 = vsyncpa [#allocation4 + $0x1], 1 }

</bundles_post_ra>
